<compile_context>
chip_gen: v7x
topology: tpu7x:2x2x1
jax: 0.10.0
libtpu: 0.0.40
codegen_flags: <defaults>
</compile_context>

<pallas_src>
import jax
import jax.numpy as jnp
from jax import lax
from jax.experimental import pallas as pl
from jax.experimental.pallas import tpu as pltpu


def _round_up(x, m):
    return ((x + m - 1) // m) * m


def _make_rnn_kernel(L, tc, bn, interleave):
    """Builds the recurrence kernel for static (L, tc, bn)."""
    ragged = (L % tc) != 0

    def kernel(xh_ref, whh_hbm_ref, h_ref, whh_vmem, dma_sem):
        # xh_ref:      (tc, bn, H_pad) pre-projected inputs (Emb@Wxh^T + biases)
        # whh_hbm_ref: (H_pad, H_pad)  recurrent weight in HBM (pre-transposed)
        # h_ref:       (bn, H_pad)     hidden state, resident across time chunks
        # whh_vmem:    (H_pad, H_pad)  single-buffered VMEM copy of the weight
        c = pl.program_id(1)

        @pl.when(c == 0)
        def _init():
            h_ref[...] = jnp.zeros_like(h_ref)
            cp = pltpu.make_async_copy(whh_hbm_ref, whh_vmem, dma_sem)
            cp.start()
            cp.wait()

        w = whh_vmem[...]                            # loaded once per chunk
        if ragged:
            valid = jnp.minimum(tc, L - c * tc)      # valid steps in this chunk

        if interleave:
            # Two independent batch sub-states: tile A's tanh (EUP) overlaps
            # tile B's matmul (MXU) inside the unrolled chunk.
            half = bn // 2

            def step(t, carry):
                h0, h1 = carry
                x = xh_ref[t]
                n0 = jnp.tanh(x[:half, :] +
                              jnp.dot(h0, w, preferred_element_type=jnp.float32))
                n1 = jnp.tanh(x[half:, :] +
                              jnp.dot(h1, w, preferred_element_type=jnp.float32))
                if ragged:
                    keep = t < valid
                    n0 = jnp.where(keep, n0, h0)
                    n1 = jnp.where(keep, n1, h1)
                return (n0, n1)

            h_full = h_ref[...]
            h0, h1 = lax.fori_loop(0, tc, step,
                                   (h_full[:half, :], h_full[half:, :]),
                                   unroll=True)
            h_ref[pl.ds(0, half), :] = h0
            h_ref[pl.ds(half, half), :] = h1
        else:
            def step(t, h):
                hn = jnp.tanh(xh_ref[t] +
                              jnp.dot(h, w, preferred_element_type=jnp.float32))
                if ragged:
                    hn = jnp.where(t < valid, hn, h)
                return hn

            h_ref[...] = lax.fori_loop(0, tc, step, h_ref[...], unroll=True)

    return kernel


def simple_rnn_forward(X, embed_table, W_xh, b_xh, W_hh, b_hh, *, t_chunk=32):
    """X: (N, L) int32 tokens.  Weights in PyTorch Linear layout:
    W_xh (H, E), W_hh (H, H), biases (H,).  Returns H_L (N, H) float32."""
    N, L = X.shape
    H = W_hh.shape[0]
    hp = jax.lax.Precision.HIGHEST

    # Lane/sublane-dense padded layout.
    N_pad = _round_up(N, 8)
    H_pad = _round_up(H, 128)

    # Batch grid tiling: 2 "parallel" tiles when large enough (v7x megacore).
    if N_pad >= 16 and N_pad % 16 == 0:
        n_btiles, bn = 2, N_pad // 2
    else:
        n_btiles, bn = 1, N_pad

    # Time-chunk size derived from an explicit VMEM budget (v7x: 64 MiB / TC).
    def _vmem_bytes(tcs):
        return (2 * tcs * bn * H_pad * 4       # xh double buffer
                + H_pad * H_pad * 4            # resident Whh (single buffer)
                + 2 * bn * H_pad * 4           # hidden-state output buffers
                + (2 << 20))                   # slack / internal scratch

    tc = max(1, min(t_chunk, L))
    budget = 40 << 20
    while tc > 1 and _vmem_bytes(tc) > budget:
        tc -= 1
    n_chunks = (L + tc - 1) // tc
    L_pad = n_chunks * tc
    vmem_limit = int(min(max(_vmem_bytes(tc) + (8 << 20), 32 << 20), 64 << 20))

    interleave = (bn >= 16) and (bn % 16 == 0)

    # --- Glue: gather-then-project, time-major, lane-dense padding ----------
    Emb = embed_table[X.T]                                        # (L, N, E)
    xh = jnp.dot(Emb, W_xh.T, precision=hp) + (b_xh + b_hh)       # (L, N, H)
    xh = xh.astype(jnp.float32)
    xh = jnp.pad(xh, ((0, L_pad - L), (0, N_pad - N), (0, H_pad - H)))

    # Recurrent weight pre-transposed to (in, out); zero-padded rows/cols keep
    # the padded hidden lanes exactly zero through the recurrence.
    Whh_t = jnp.pad(W_hh.T.astype(jnp.float32),
                    ((0, H_pad - H), (0, H_pad - H)))             # (H_pad, H_pad)

    kernel = _make_rnn_kernel(L, tc, bn, interleave)

    out = pl.pallas_call(
        kernel,
        out_shape=jax.ShapeDtypeStruct((N_pad, H_pad), jnp.float32),
        grid_spec=pltpu.PrefetchScalarGridSpec(
            num_scalar_prefetch=0,
            grid=(n_btiles, n_chunks),
            in_specs=[
                # Stream one time-chunk of pre-projected inputs per grid step.
                pl.BlockSpec((tc, bn, H_pad), lambda b, c: (c, b, 0)),
                # Recurrent weight stays in HBM; copied once into VMEM scratch.
                pl.BlockSpec(memory_space=pl.ANY),
            ],
            # Same output block across the time axis -> hidden-state accumulator.
            out_specs=pl.BlockSpec((bn, H_pad), lambda b, c: (b, 0)),
            scratch_shapes=[
                pltpu.VMEM((H_pad, H_pad), jnp.float32),   # single-buffered Whh
                pltpu.SemaphoreType.DMA(()),
            ],
        ),
        compiler_params=pltpu.CompilerParams(
            dimension_semantics=("parallel", "arbitrary"),
            vmem_limit_bytes=vmem_limit),
        cost_estimate=pl.CostEstimate(
            flops=2 * L * N_pad * H_pad * H_pad + 2 * L * N_pad * H_pad,
            transcendentals=L * N_pad * H_pad,
            bytes_accessed=4 * (L_pad * N_pad * H_pad + H_pad * H_pad
                                + N_pad * H_pad)),
    )(xh, Whh_t)

    return out[:N, :H]


def simple_rnn_reference(X, embed_table, W_xh, b_xh, W_hh, b_hh):
    """Pure-JAX reference mirroring the PyTorch forward loop."""
    N, L = X.shape
    H = W_hh.shape[0]
    hp = jax.lax.Precision.HIGHEST
    h = jnp.zeros((N, H), jnp.float32)
    for t in range(L):
        e = embed_table[X[:, t]]
        h = jnp.tanh(jnp.dot(e, W_xh.T, precision=hp) + b_xh +
                     jnp.dot(h, W_hh.T, precision=hp) + b_hh)
    return h


if __name__ == "__main__":
    # Small, PyTorch-consistent shapes.
    vocab_size, embed_size, hidden_size = 50, 32, 32
    N, L = 2, 8

    key = jax.random.PRNGKey(0)
    k_emb, k_wxh, k_bxh, k_whh, k_bhh, k_x = jax.random.split(key, 6)

    embed_table = jax.random.normal(k_emb, (vocab_size, embed_size), jnp.float32)
    W_xh = 0.1 * jax.random.normal(k_wxh, (hidden_size, embed_size), jnp.float32)
    b_xh = 0.1 * jax.random.normal(k_bxh, (hidden_size,), jnp.float32)
    W_hh = 0.1 * jax.random.normal(k_whh, (hidden_size, hidden_size), jnp.float32)
    b_hh = 0.1 * jax.random.normal(k_bhh, (hidden_size,), jnp.float32)

    X = jax.random.randint(k_x, (N, L), 0, vocab_size, dtype=jnp.int32)

    out = simple_rnn_forward(X, embed_table, W_xh, b_xh, W_hh, b_hh)
    out = jax.block_until_ready(out)

    ref = simple_rnn_reference(X, embed_table, W_xh, b_xh, W_hh, b_hh)
    assert out.shape == (N, hidden_size)
    assert jnp.allclose(out, ref, atol=1e-5, rtol=1e-5), "mismatch vs reference"

    print("KERNEL_OK")
</pallas_src>

<mosaic_0001>
module attributes {stable_mosaic.version = 11 : i64} {
  func.func @kernel(%arg0: i32, %arg1: i32, %arg2: memref<8x8x128xf32, #tpu.memory_space<vmem>>, %arg3: memref<128x128xf32, #tpu.memory_space<any>>, %arg4: memref<8x128xf32, #tpu.memory_space<vmem>>, %arg5: memref<128x128xf32, #tpu.memory_space<vmem>>, %arg6: memref<!tpu.dma_semaphore, #tpu.memory_space<semaphore_mem>>) attributes {dimension_semantics = [#tpu.dimension_semantics<parallel>, #tpu.dimension_semantics<arbitrary>], iteration_bounds = array<i64: 1, 1>, scalar_prefetch = 0 : i64, scratch_operands = 2 : i64, tpu.core_type = #tpu.core_type<tc>, window_params = [{transform_indices = @transform_0, window_bounds = array<i64: 8, 8, 128>}, {}, {transform_indices = @transform_2, window_bounds = array<i64: 8, 128>}]} {
    %c0_i32 = arith.constant 0 : i32
    %0 = arith.cmpi eq, %arg1, %c0_i32 : i32
    %1 = arith.extui %0 : i1 to i32
    %c0_i32_0 = arith.constant 0 : i32
    %2 = arith.cmpi ne, %1, %c0_i32_0 : i32
    scf.if %2 {
      %cst_30 = arith.constant 0.000000e+00 : f32
      %54 = vector.broadcast %cst_30 : f32 to vector<8x128xf32>
      %c0_31 = arith.constant 0 : index
      %c0_32 = arith.constant 0 : index
      %55 = vector.load %arg4[%c0_31, %c0_32] : memref<8x128xf32, #tpu.memory_space<vmem>>, vector<8x128xf32>
      tpu.vector_store %arg4[%c0_31, %c0_32], %54 {strides = array<i32>} : memref<8x128xf32, #tpu.memory_space<vmem>>, vector<8x128xf32>,
      tpu.enqueue_dma source(%arg3 : memref<128x128xf32, #tpu.memory_space<any>>) target(%arg5 : memref<128x128xf32, #tpu.memory_space<vmem>>) target_semaphore(%arg6 : memref<!tpu.dma_semaphore, #tpu.memory_space<semaphore_mem>>)
      tpu.wait_dma2 semaphore(%arg6 : memref<!tpu.dma_semaphore, #tpu.memory_space<semaphore_mem>>) src(%arg3 : memref<128x128xf32, #tpu.memory_space<any>>) dst(%arg5 : memref<128x128xf32, #tpu.memory_space<vmem>>)
    } else {
    }
    %c0 = arith.constant 0 : index
    %c0_1 = arith.constant 0 : index
    %3 = vector.load %arg5[%c0, %c0_1] : memref<128x128xf32, #tpu.memory_space<vmem>>, vector<128x128xf32>
    %c0_2 = arith.constant 0 : index
    %c0_3 = arith.constant 0 : index
    %4 = vector.load %arg4[%c0_2, %c0_3] : memref<8x128xf32, #tpu.memory_space<vmem>>, vector<8x128xf32>
    %c0_i32_4 = arith.constant 0 : i32
    %5 = arith.index_cast %c0_i32_4 : i32 to index
    %c0_5 = arith.constant 0 : index
    %c0_6 = arith.constant 0 : index
    %6 = vector.load %arg2[%5, %c0_5, %c0_6] : memref<8x8x128xf32, #tpu.memory_space<vmem>>, vector<1x8x128xf32>
    %7 = vector.shape_cast %6 : vector<1x8x128xf32> to vector<8x128xf32>
    %cst = arith.constant dense<0.000000e+00> : vector<8x128xf32>
    %8 = tpu.matmul %4, %3, %cst {dimension_numbers = #tpu.dot_dimension_numbers<[1], [0], [0], [1], [0, 0, 1, 1], [], []>} : vector<8x128xf32>, vector<128x128xf32>, vector<8x128xf32> -> vector<8x128xf32>
    %9 = arith.addf %7, %8 : vector<8x128xf32>
    %10 = math.tanh %9 : vector<8x128xf32>
    %c1_i32 = arith.constant 1 : i32
    %11 = arith.index_cast %c1_i32 : i32 to index
    %c0_7 = arith.constant 0 : index
    %c0_8 = arith.constant 0 : index
    %12 = vector.load %arg2[%11, %c0_7, %c0_8] : memref<8x8x128xf32, #tpu.memory_space<vmem>>, vector<1x8x128xf32>
    %13 = vector.shape_cast %12 : vector<1x8x128xf32> to vector<8x128xf32>
    %cst_9 = arith.constant dense<0.000000e+00> : vector<8x128xf32>
    %14 = tpu.matmul %10, %3, %cst_9 {dimension_numbers = #tpu.dot_dimension_numbers<[1], [0], [0], [1], [0, 0, 1, 1], [], []>} : vector<8x128xf32>, vector<128x128xf32>, vector<8x128xf32> -> vector<8x128xf32>
    %15 = arith.addf %13, %14 : vector<8x128xf32>
    %16 = math.tanh %15 : vector<8x128xf32>
    %c2_i32 = arith.constant 2 : i32
    %17 = arith.index_cast %c2_i32 : i32 to index
    %c0_10 = arith.constant 0 : index
    %c0_11 = arith.constant 0 : index
    %18 = vector.load %arg2[%17, %c0_10, %c0_11] : memref<8x8x128xf32, #tpu.memory_space<vmem>>, vector<1x8x128xf32>
    %19 = vector.shape_cast %18 : vector<1x8x128xf32> to vector<8x128xf32>
    %cst_12 = arith.constant dense<0.000000e+00> : vector<8x128xf32>
    %20 = tpu.matmul %16, %3, %cst_12 {dimension_numbers = #tpu.dot_dimension_numbers<[1], [0], [0], [1], [0, 0, 1, 1], [], []>} : vector<8x128xf32>, vector<128x128xf32>, vector<8x128xf32> -> vector<8x128xf32>
    %21 = arith.addf %19, %20 : vector<8x128xf32>
    %22 = math.tanh %21 : vector<8x128xf32>
    %c3_i32 = arith.constant 3 : i32
    %23 = arith.index_cast %c3_i32 : i32 to index
    %c0_13 = arith.constant 0 : index
    %c0_14 = arith.constant 0 : index
    %24 = vector.load %arg2[%23, %c0_13, %c0_14] : memref<8x8x128xf32, #tpu.memory_space<vmem>>, vector<1x8x128xf32>
    %25 = vector.shape_cast %24 : vector<1x8x128xf32> to vector<8x128xf32>
    %cst_15 = arith.constant dense<0.000000e+00> : vector<8x128xf32>
    %26 = tpu.matmul %22, %3, %cst_15 {dimension_numbers = #tpu.dot_dimension_numbers<[1], [0], [0], [1], [0, 0, 1, 1], [], []>} : vector<8x128xf32>, vector<128x128xf32>, vector<8x128xf32> -> vector<8x128xf32>
    %27 = arith.addf %25, %26 : vector<8x128xf32>
    %28 = math.tanh %27 : vector<8x128xf32>
    %c4_i32 = arith.constant 4 : i32
    %29 = arith.index_cast %c4_i32 : i32 to index
    %c0_16 = arith.constant 0 : index
    %c0_17 = arith.constant 0 : index
    %30 = vector.load %arg2[%29, %c0_16, %c0_17] : memref<8x8x128xf32, #tpu.memory_space<vmem>>, vector<1x8x128xf32>
    %31 = vector.shape_cast %30 : vector<1x8x128xf32> to vector<8x128xf32>
    %cst_18 = arith.constant dense<0.000000e+00> : vector<8x128xf32>
    %32 = tpu.matmul %28, %3, %cst_18 {dimension_numbers = #tpu.dot_dimension_numbers<[1], [0], [0], [1], [0, 0, 1, 1], [], []>} : vector<8x128xf32>, vector<128x128xf32>, vector<8x128xf32> -> vector<8x128xf32>
    %33 = arith.addf %31, %32 : vector<8x128xf32>
    %34 = math.tanh %33 : vector<8x128xf32>
    %c5_i32 = arith.constant 5 : i32
    %35 = arith.index_cast %c5_i32 : i32 to index
    %c0_19 = arith.constant 0 : index
    %c0_20 = arith.constant 0 : index
    %36 = vector.load %arg2[%35, %c0_19, %c0_20] : memref<8x8x128xf32, #tpu.memory_space<vmem>>, vector<1x8x128xf32>
    %37 = vector.shape_cast %36 : vector<1x8x128xf32> to vector<8x128xf32>
    %cst_21 = arith.constant dense<0.000000e+00> : vector<8x128xf32>
    %38 = tpu.matmul %34, %3, %cst_21 {dimension_numbers = #tpu.dot_dimension_numbers<[1], [0], [0], [1], [0, 0, 1, 1], [], []>} : vector<8x128xf32>, vector<128x128xf32>, vector<8x128xf32> -> vector<8x128xf32>
    %39 = arith.addf %37, %38 : vector<8x128xf32>
    %40 = math.tanh %39 : vector<8x128xf32>
    %c6_i32 = arith.constant 6 : i32
    %41 = arith.index_cast %c6_i32 : i32 to index
    %c0_22 = arith.constant 0 : index
    %c0_23 = arith.constant 0 : index
    %42 = vector.load %arg2[%41, %c0_22, %c0_23] : memref<8x8x128xf32, #tpu.memory_space<vmem>>, vector<1x8x128xf32>
    %43 = vector.shape_cast %42 : vector<1x8x128xf32> to vector<8x128xf32>
    %cst_24 = arith.constant dense<0.000000e+00> : vector<8x128xf32>
    %44 = tpu.matmul %40, %3, %cst_24 {dimension_numbers = #tpu.dot_dimension_numbers<[1], [0], [0], [1], [0, 0, 1, 1], [], []>} : vector<8x128xf32>, vector<128x128xf32>, vector<8x128xf32> -> vector<8x128xf32>
    %45 = arith.addf %43, %44 : vector<8x128xf32>
    %46 = math.tanh %45 : vector<8x128xf32>
    %c7_i32 = arith.constant 7 : i32
    %47 = arith.index_cast %c7_i32 : i32 to index
    %c0_25 = arith.constant 0 : index
    %c0_26 = arith.constant 0 : index
    %48 = vector.load %arg2[%47, %c0_25, %c0_26] : memref<8x8x128xf32, #tpu.memory_space<vmem>>, vector<1x8x128xf32>
    %49 = vector.shape_cast %48 : vector<1x8x128xf32> to vector<8x128xf32>
    %cst_27 = arith.constant dense<0.000000e+00> : vector<8x128xf32>
    %50 = tpu.matmul %46, %3, %cst_27 {dimension_numbers = #tpu.dot_dimension_numbers<[1], [0], [0], [1], [0, 0, 1, 1], [], []>} : vector<8x128xf32>, vector<128x128xf32>, vector<8x128xf32> -> vector<8x128xf32>
    %51 = arith.addf %49, %50 : vector<8x128xf32>
    %52 = math.tanh %51 : vector<8x128xf32>
    %c8_i32 = arith.constant 8 : i32
    %c0_28 = arith.constant 0 : index
    %c0_29 = arith.constant 0 : index
    %53 = vector.load %arg4[%c0_28, %c0_29] : memref<8x128xf32, #tpu.memory_space<vmem>>, vector<8x128xf32>
    tpu.vector_store %arg4[%c0_28, %c0_29], %52 {strides = array<i32>} : memref<8x128xf32, #tpu.memory_space<vmem>>, vector<8x128xf32>,
    return
  }
  func.func @transform_0(%arg0: i32, %arg1: i32) -> (i32, i32, i32) {
    %c0_i32 = arith.constant 0 : i32
    %c0_i32_0 = arith.constant 0 : i32
    return %arg1, %arg0, %c0_i32 : i32, i32, i32
  }
  func.func @transform_2(%arg0: i32, %arg1: i32) -> (i32, i32) {
    %c0_i32 = arith.constant 0 : i32
    %c0_i32_0 = arith.constant 0 : i32
    return %arg0, %c0_i32 : i32, i32
  }
}

</mosaic_0001>

<bundles_post_ra>
// kernel: tpu_custom_call.1
= control target key start
LH: loop header
LB: loop body
LE: loop exit
PB: predicated region body
PF: predicated region fallthrough
CT: control target
= control target key end

     0   :  { %7 = vsyncpa [#allocation5], 0  ;;  %s1598_s0 = inlined_call_operand.hbm [shape: f32[8,8,128], index: 0, kind: input, shape index: {}]   ;;  %s1599_s1 = inlined_call_operand.hbm [shape: f32[128,128], index: 1, kind: input, shape index: {}]   ;;  %s1600_s2 = inlined_call_operand.hbm [shape: f32[8,128], index: 2, kind: output, shape index: {}]  }
   0x1   :  { %8 = vsyncpa [#allocation6], 0  ;;  %s1378_s9 = smov [#allocation4]   ;;  %s1306_s13 = scalar_lea.hbm %s1598_s0, 1024 }
   0x2   :  { %s14_s10 = sshll.u32 %s1378_s9, 4  ;;  %p1307_p0 = scmp.ne.s32.totalorder %s1598_s0, %s1306_s13  ;;  %s15_s10 = int_to_ptr.vmem [resolvable:$true] %s14_s10 }
   0x3   :  { %p1310_p1 = scmp.lt.u32.totalorder %s1306_s13, %s1598_s0 }
   0x5   :  { %p1312_p2 = pnand %p1310_p1, %p1307_p0 }
   0x7   :  { %1315 = shalt.err (!%p1312_p2)
}
   0x8   :  { %s1316_s18 = scalar_lea.vmem %s15_s10, 1024  ;;  %p1321_p4 = scmp.lt.s32.totalorder %s15_s10, %s15_s10 }
   0x9   :  { %p1317_p3 = scmp.ne.s32.totalorder %s15_s10, %s1316_s18  ;;  %p1322_p5 = scmp.lt.s32.totalorder %s1316_s18, %s1316_s18 }
   0xb   :  { %p1323_p6 = por %p1322_p5, %p1321_p4 }
   0xd   :  { %p1324_p7 = pnand %p1323_p6, %p1317_p3 }
   0xf   :  { %1327 = shalt.err (!%p1324_p7)
}
  0x10   :  { %s1379_s19 = smov 128   ;;  %s1380_s20 = smov 8  }
  0x11   :  { %20 = dma.hbm_to_vmem [thread:$0]  %s1598_s0, 1024, %s15_s10, [#allocation5], %s1379_s19, %s1379_s19, %s1380_s20  }
  0x12   :  { %1372 = dma.done.wait [#allocation5], 1024  }
  0x13   :  { %1373 = vsyncadd [#allocation5], 4294966272  ;;  %v1381_v0 = vmov 0.0   ;;  %s1382_s23 = smov [#allocation2]   ;;  %s1328_s27 = scalar_lea.hbm %s1599_s1, 2048 }
  0x14   :  { %28 = vst [vmem:[#allocation7] sm:$0xff] %v1381_v0  ;;  %s36_s24 = sshll.u32 %s1382_s23, 4  ;;  %p1329_p8 = scmp.ne.s32.totalorder %s1599_s1, %s1328_s27  ;;  %s37_s24 = int_to_ptr.vmem [resolvable:$true] %s36_s24 }
  0x15   :  { %p1332_p9 = scmp.lt.u32.totalorder %s1328_s27, %s1599_s1 }
  0x17   :  { %p1334_p10 = pnand %p1332_p9, %p1329_p8 }
  0x19   :  { %1337 = shalt.err (!%p1334_p10)  }
  0x1a   :  { %s1338_s0 = scalar_lea.vmem %s37_s24, 2048  ;;  %p1343_p12 = scmp.lt.s32.totalorder %s37_s24, %s37_s24 }
  0x1b   :  { %p1339_p11 = scmp.ne.s32.totalorder %s37_s24, %s1338_s0  ;;  %p1344_p13 = scmp.lt.s32.totalorder %s1338_s0, %s1338_s0 }
  0x1d   :  { %p1345_p0 = por %p1344_p13, %p1343_p12 }
  0x1f   :  { %p1346_p1 = pnand %p1345_p0, %p1339_p11 }
  0x21   :  { %1349 = shalt.err (!%p1346_p1)  }
  0x22   :  { %39 = dma.hbm_to_vmem [thread:$0]  %s1599_s1, 2048, %s37_s24, [#allocation3] }
  0x23   :  { %1374 = dma.done.wait [#allocation3], 2048 }
  0x24   :  { %1375 = vsyncadd [#allocation3], 4294965248  ;;  %v1383_v1 = vmov 0.0|0.0   ;;  %vm1384_vm0 = vmmov 0   ;;  %v43_v2 = vld [vmem:[#allocation2] sm:$0xff]  ;;  %v44_v3 = vld [vmem:[#allocation2 + $0x8] sm:$0xff] }
  0x25   :  { %1090 = vmatprep.subr.bf16.mxu0 %v1383_v1  ;;  %842 = vmatprep.mubr.msk.f32.mxu0 %vm1384_vm0, %v1381_v0  ;;  %v45_v4 = vld [vmem:[#allocation2 + $0x10] sm:$0xff]  ;;  %v1432_v5 = vpack.c.bf16 %v44_v3, %v43_v2  ;;  %v46_v6 = vld [vmem:[#allocation2 + $0x18] sm:$0xff]  ;;  %v47_v8 = vld [vmem:[#allocation2 + $0x20] sm:$0xff]  ;;  %s1385_s1 = smov [#allocation7]  }
  0x26   :  { %1114 = vmatprep.subr.bf16.mxu1 %v1383_v1  ;;  %877 = vmatprep.mubr.msk.f32.mxu1 %vm1384_vm0, %v1381_v0  ;;  %v1435_v7 = vpack.c.bf16 %v46_v6, %v45_v4  ;;  %v48_v9 = vld [vmem:[#allocation2 + $0x28] sm:$0xff]  ;;  %v49_v11 = vld [vmem:[#allocation2 + $0x30] sm:$0xff]  ;;  %v50_v12 = vld [vmem:[#allocation2 + $0x38] sm:$0xff]  ;;  %s658_s6 = sshll.u32 %s1385_s1, 4  ;;  %s659_s6 = int_to_ptr.vmem [resolvable:$true] %s658_s6 }
  0x27   :  { %1092 = vmatpush3.bf16.msra.mxu0 %v1432_v5  ;;  %1116 = vmatpush3.bf16.msra.mxu1 %v1432_v5  ;;  %v1441_v10 = vpack.c.bf16 %v48_v9, %v47_v8  ;;  %v1447_v13 = vpack.c.bf16 %v50_v12, %v49_v11  ;;  %v51_v14 = vld [vmem:[#allocation2 + $0x40] sm:$0xff]  ;;  %v52_v15 = vld [vmem:[#allocation2 + $0x48] sm:$0xff]  ;;  %v53_v17 = vld [vmem:[#allocation2 + $0x50] sm:$0xff]  ;;  %s1350_s7 = scalar_lea.vmem %s659_s6, 128  ;;  %p1355_p3 = scmp.lt.s32.totalorder %s659_s6, %s659_s6 }
  0x28   :  { %1093 = vmatprep.subr.bf16.mxu0 %v1383_v1  ;;  %1117 = vmatprep.subr.bf16.mxu1 %v1383_v1  ;;  %v1453_v16 = vpack.c.bf16 %v52_v15, %v51_v14  ;;  %v54_v18 = vld [vmem:[#allocation2 + $0x58] sm:$0xff]  ;;  %v55_v20 = vld [vmem:[#allocation2 + $0x60] sm:$0xff]  ;;  %v56_v21 = vld [vmem:[#allocation2 + $0x68] sm:$0xff]  ;;  %p1351_p2 = scmp.ne.s32.totalorder %s659_s6, %s1350_s7  ;;  %p1356_p4 = scmp.lt.s32.totalorder %s1350_s7, %s1350_s7 }
  0x29   :  { %v1459_v19 = vpack.c.bf16 %v54_v18, %v53_v17  ;;  %v1465_v22 = vpack.c.bf16 %v56_v21, %v55_v20  ;;  %v57_v23 = vld [vmem:[#allocation2 + $0x70] sm:$0xff]  ;;  %v58_v24 = vld [vmem:[#allocation2 + $0x78] sm:$0xff]  ;;  %v59_v26 = vld [vmem:[#allocation7] sm:$0xff] }
  0x2a   :  { %v1471_v25 = vpack.c.bf16 %v58_v24, %v57_v23  ;;  %v60_v27 = vld [vmem:[#allocation4] sm:$0xff]  ;;  %v134_v32 = vld [vmem:[#allocation4 + $0x8] sm:$0xff]  ;;  %v208_v37 = vld [vmem:[#allocation4 + $0x10] sm:$0xff]  ;;  %p1357_p5 = por %p1356_p4, %p1355_p3 }
  0x2b   :  { %1095 = vmatpush3.bf16.msra.mxu0 %v1435_v7  ;;  %1119 = vmatpush3.bf16.msra.mxu1 %v1435_v7  ;;  %v282_v42 = vld [vmem:[#allocation4 + $0x18] sm:$0xff]  ;;  %v356_v47 = vld [vmem:[#allocation4 + $0x20] sm:$0xff]  ;;  %v430_v52 = vld [vmem:[#allocation4 + $0x28] sm:$0xff] }
  0x2c   :  { %1096 = vmatprep.subr.bf16.mxu0 %v1383_v1  ;;  %1120 = vmatprep.subr.bf16.mxu1 %v1383_v1  ;;  %v504_v57 = vld [vmem:[#allocation4 + $0x30] sm:$0xff]  ;;  %v578_v62 = vld [vmem:[#allocation4 + $0x38] sm:$0xff]  ;;  %p1358_p6 = pnand %p1357_p5, %p1351_p2 }
  0x2f   :  { %1098 = vmatpush3.bf16.msra.mxu0 %v1441_v10  ;;  %1122 = vmatpush3.bf16.msra.mxu1 %v1441_v10 }
  0x30   :  { %1099 = vmatprep.subr.bf16.mxu0 %v1383_v1  ;;  %1123 = vmatprep.subr.bf16.mxu1 %v1383_v1 }
  0x33   :  { %1101 = vmatpush3.bf16.msra.mxu0 %v1447_v13  ;;  %1125 = vmatpush3.bf16.msra.mxu1 %v1447_v13 }
  0x34   :  { %1102 = vmatprep.subr.bf16.mxu0 %v1383_v1  ;;  %1126 = vmatprep.subr.bf16.mxu1 %v1383_v1 }
  0x37   :  { %1104 = vmatpush3.bf16.msra.mxu0 %v1453_v16  ;;  %1128 = vmatpush3.bf16.msra.mxu1 %v1453_v16 }
  0x38   :  { %1105 = vmatprep.subr.bf16.mxu0 %v1383_v1  ;;  %1129 = vmatprep.subr.bf16.mxu1 %v1383_v1 }
  0x3b   :  { %1107 = vmatpush3.bf16.msra.mxu0 %v1459_v19  ;;  %1131 = vmatpush3.bf16.msra.mxu1 %v1459_v19 }
  0x3c   :  { %1108 = vmatprep.subr.bf16.mxu0 %v1383_v1  ;;  %1132 = vmatprep.subr.bf16.mxu1 %v1383_v1 }
  0x3f   :  { %1110 = vmatpush3.bf16.msra.mxu0 %v1465_v22  ;;  %1134 = vmatpush3.bf16.msra.mxu1 %v1465_v22 }
  0x40   :  { %1111 = vmatprep.subr.bf16.mxu0 %v1383_v1  ;;  %1135 = vmatprep.subr.bf16.mxu1 %v1383_v1 }
  0x43   :  { %1113 = vmatpush3.bf16.msra.mxu0 %v1471_v25  ;;  %1137 = vmatpush3.bf16.msra.mxu1 %v1471_v25 }
  0x44   :  { %1138 = vmatprep.subr.bf16.mxu0 %v1383_v1  ;;  %1162 = vmatprep.subr.bf16.mxu1 %v1383_v1 }
  0x46   :  { %843 = vmatmul.mubr.f32.vlgmr.msra.gmra.mrb[0].mxu0 %v59_v26 }
  0x47   :  { %1140 = vmatpush3.bf16.msra.mxu0 %v1432_v5  ;;  %912 = vmatprep.mubr.msk.f32.mxu0 %vm1384_vm0, %v1381_v0 }
  0x48   :  { %1141 = vmatprep.subr.bf16.mxu0 %v1383_v1 }
  0x4b   :  { %1143 = vmatpush3.bf16.msra.mxu0 %v1435_v7 }
  0x4c   :  { %1144 = vmatprep.subr.bf16.mxu0 %v1383_v1 }
  0x4f   :  { %1146 = vmatpush3.bf16.msra.mxu0 %v1441_v10 }
  0x50   :  { %1147 = vmatprep.subr.bf16.mxu0 %v1383_v1 }
  0x53   :  { %1149 = vmatpush3.bf16.msra.mxu0 %v1447_v13 }
  0x54   :  { %1150 = vmatprep.subr.bf16.mxu0 %v1383_v1 }
  0x57   :  { %1152 = vmatpush3.bf16.msra.mxu0 %v1453_v16 }
  0x58   :  { %1153 = vmatprep.subr.bf16.mxu0 %v1383_v1 }
  0x5b   :  { %1155 = vmatpush3.bf16.msra.mxu0 %v1459_v19 }
  0x5c   :  { %1156 = vmatprep.subr.bf16.mxu0 %v1383_v1 }
  0x5f   :  { %1158 = vmatpush3.bf16.msra.mxu0 %v1465_v22 }
  0x60   :  { %1159 = vmatprep.subr.bf16.mxu0 %v1383_v1 }
  0x63   :  { %1161 = vmatpush3.bf16.msra.mxu0 %v1471_v25 }
  0x64   :  { %1186 = vmatprep.subr.bf16.mxu0 %v1383_v1 }
 0x119   :  { %v127_v28 = vpop.f32.mrb[0].mxu0 }
 0x11a   :  { %v131_v29 = vadd.f32 %v127_v28, %v60_v27  ;;  %v844_v30 = vpop.f32.mrb[1].mxu0 }
 0x11c   :  { %1290 = vtanh.f32 %v131_v29 }
 0x126   :  { %v1291_v31 = vpop.eup %1290 }
 0x127   :  { %878 = vmatmul.mubr.f32.vlgmr.msra.gmra.mrb[0].mxu1 %v1291_v31 }
 0x128   :  { %1164 = vmatpush3.bf16.msra.mxu1 %v1432_v5  ;;  %947 = vmatprep.mubr.msk.f32.mxu1 %vm1384_vm0, %v1381_v0 }
 0x129   :  { %1165 = vmatprep.subr.bf16.mxu1 %v1383_v1 }
 0x12c   :  { %1167 = vmatpush3.bf16.msra.mxu1 %v1435_v7 }
 0x12d   :  { %1168 = vmatprep.subr.bf16.mxu1 %v1383_v1 }
 0x130   :  { %1170 = vmatpush3.bf16.msra.mxu1 %v1441_v10 }
 0x131   :  { %1171 = vmatprep.subr.bf16.mxu1 %v1383_v1 }
 0x134   :  { %1173 = vmatpush3.bf16.msra.mxu1 %v1447_v13 }
 0x135   :  { %1174 = vmatprep.subr.bf16.mxu1 %v1383_v1 }
 0x138   :  { %1176 = vmatpush3.bf16.msra.mxu1 %v1453_v16 }
 0x139   :  { %1177 = vmatprep.subr.bf16.mxu1 %v1383_v1 }
 0x13c   :  { %1179 = vmatpush3.bf16.msra.mxu1 %v1459_v19 }
 0x13d   :  { %1180 = vmatprep.subr.bf16.mxu1 %v1383_v1 }
 0x140   :  { %1182 = vmatpush3.bf16.msra.mxu1 %v1465_v22 }
 0x141   :  { %1183 = vmatprep.subr.bf16.mxu1 %v1383_v1 }
 0x144   :  { %1185 = vmatpush3.bf16.msra.mxu1 %v1471_v25 }
 0x145   :  { %1210 = vmatprep.subr.bf16.mxu1 %v1383_v1 }
 0x1fa   :  { %v201_v33 = vpop.f32.mrb[0].mxu1 }
 0x1fb   :  { %v205_v34 = vadd.f32 %v201_v33, %v134_v32  ;;  %v879_v35 = vpop.f32.mrb[1].mxu1 }
 0x1fd   :  { %1292 = vtanh.f32 %v205_v34 }
 0x207   :  { %v1293_v36 = vpop.eup %1292 }
 0x208   :  { %913 = vmatmul.mubr.f32.vlgmr.msra.gmra.mrb[2].mxu0 %v1293_v36 }
 0x209   :  { %1188 = vmatpush3.bf16.msra.mxu0 %v1432_v5  ;;  %982 = vmatprep.mubr.msk.f32.mxu0 %vm1384_vm0, %v1381_v0 }
 0x20a   :  { %1189 = vmatprep.subr.bf16.mxu0 %v1383_v1 }
 0x20d   :  { %1191 = vmatpush3.bf16.msra.mxu0 %v1435_v7 }
 0x20e   :  { %1192 = vmatprep.subr.bf16.mxu0 %v1383_v1 }
 0x211   :  { %1194 = vmatpush3.bf16.msra.mxu0 %v1441_v10 }
 0x212   :  { %1195 = vmatprep.subr.bf16.mxu0 %v1383_v1 }
 0x215   :  { %1197 = vmatpush3.bf16.msra.mxu0 %v1447_v13 }
 0x216   :  { %1198 = vmatprep.subr.bf16.mxu0 %v1383_v1 }
 0x219   :  { %1200 = vmatpush3.bf16.msra.mxu0 %v1453_v16 }
 0x21a   :  { %1201 = vmatprep.subr.bf16.mxu0 %v1383_v1 }
 0x21d   :  { %1203 = vmatpush3.bf16.msra.mxu0 %v1459_v19 }
 0x21e   :  { %1204 = vmatprep.subr.bf16.mxu0 %v1383_v1 }
 0x221   :  { %1206 = vmatpush3.bf16.msra.mxu0 %v1465_v22 }
 0x222   :  { %1207 = vmatprep.subr.bf16.mxu0 %v1383_v1 }
 0x225   :  { %1209 = vmatpush3.bf16.msra.mxu0 %v1471_v25 }
 0x226   :  { %1234 = vmatprep.subr.bf16.mxu0 %v1383_v1 }
 0x2db   :  { %v275_v38 = vpop.f32.mrb[2].mxu0 }
 0x2dc   :  { %v279_v39 = vadd.f32 %v275_v38, %v208_v37  ;;  %v914_v40 = vpop.f32.mrb[3].mxu0 }
 0x2de   :  { %1294 = vtanh.f32 %v279_v39 }
 0x2e8   :  { %v1295_v41 = vpop.eup %1294 }
 0x2e9   :  { %948 = vmatmul.mubr.f32.vlgmr.msra.gmra.mrb[2].mxu1 %v1295_v41 }
 0x2ea   :  { %1212 = vmatpush3.bf16.msra.mxu1 %v1432_v5  ;;  %1017 = vmatprep.mubr.msk.f32.mxu1 %vm1384_vm0, %v1381_v0 }
 0x2eb   :  { %1213 = vmatprep.subr.bf16.mxu1 %v1383_v1 }
 0x2ee   :  { %1215 = vmatpush3.bf16.msra.mxu1 %v1435_v7 }
 0x2ef   :  { %1216 = vmatprep.subr.bf16.mxu1 %v1383_v1 }
 0x2f2   :  { %1218 = vmatpush3.bf16.msra.mxu1 %v1441_v10 }
 0x2f3   :  { %1219 = vmatprep.subr.bf16.mxu1 %v1383_v1 }
 0x2f6   :  { %1221 = vmatpush3.bf16.msra.mxu1 %v1447_v13 }
 0x2f7   :  { %1222 = vmatprep.subr.bf16.mxu1 %v1383_v1 }
 0x2fa   :  { %1224 = vmatpush3.bf16.msra.mxu1 %v1453_v16 }
 0x2fb   :  { %1225 = vmatprep.subr.bf16.mxu1 %v1383_v1 }
 0x2fe   :  { %1227 = vmatpush3.bf16.msra.mxu1 %v1459_v19 }
 0x2ff   :  { %1228 = vmatprep.subr.bf16.mxu1 %v1383_v1 }
 0x302   :  { %1230 = vmatpush3.bf16.msra.mxu1 %v1465_v22 }
 0x303   :  { %1231 = vmatprep.subr.bf16.mxu1 %v1383_v1 }
 0x306   :  { %1233 = vmatpush3.bf16.msra.mxu1 %v1471_v25 }
 0x307   :  { %1258 = vmatprep.subr.bf16.mxu1 %v1383_v1 }
 0x3bc   :  { %v349_v43 = vpop.f32.mrb[2].mxu1 }
 0x3bd   :  { %v353_v44 = vadd.f32 %v349_v43, %v282_v42  ;;  %v949_v45 = vpop.f32.mrb[3].mxu1 }
 0x3bf   :  { %1296 = vtanh.f32 %v353_v44 }
 0x3c9   :  { %v1297_v46 = vpop.eup %1296 }
 0x3ca   :  { %983 = vmatmul.mubr.f32.vlgmr.msra.gmra.mrb[4].mxu0 %v1297_v46 }
 0x3cb   :  { %1236 = vmatpush3.bf16.msra.mxu0 %v1432_v5  ;;  %1052 = vmatprep.mubr.msk.f32.mxu0 %vm1384_vm0, %v1381_v0 }
 0x3cc   :  { %1237 = vmatprep.subr.bf16.mxu0 %v1383_v1 }
 0x3cf   :  { %1239 = vmatpush3.bf16.msra.mxu0 %v1435_v7 }
 0x3d0   :  { %1240 = vmatprep.subr.bf16.mxu0 %v1383_v1 }
 0x3d3   :  { %1242 = vmatpush3.bf16.msra.mxu0 %v1441_v10 }
 0x3d4   :  { %1243 = vmatprep.subr.bf16.mxu0 %v1383_v1 }
 0x3d7   :  { %1245 = vmatpush3.bf16.msra.mxu0 %v1447_v13 }
 0x3d8   :  { %1246 = vmatprep.subr.bf16.mxu0 %v1383_v1 }
 0x3db   :  { %1248 = vmatpush3.bf16.msra.mxu0 %v1453_v16 }
 0x3dc   :  { %1249 = vmatprep.subr.bf16.mxu0 %v1383_v1 }
 0x3df   :  { %1251 = vmatpush3.bf16.msra.mxu0 %v1459_v19 }
 0x3e0   :  { %1252 = vmatprep.subr.bf16.mxu0 %v1383_v1 }
 0x3e3   :  { %1254 = vmatpush3.bf16.msra.mxu0 %v1465_v22 }
 0x3e4   :  { %1255 = vmatprep.subr.bf16.mxu0 %v1383_v1 }
 0x3e7   :  { %1257 = vmatpush3.bf16.msra.mxu0 %v1471_v25 }
 0x49d   :  { %v423_v48 = vpop.f32.mrb[4].mxu0 }
 0x49e   :  { %v427_v49 = vadd.f32 %v423_v48, %v356_v47  ;;  %v984_v50 = vpop.f32.mrb[5].mxu0 }
 0x4a0   :  { %1298 = vtanh.f32 %v427_v49 }
 0x4aa   :  { %v1299_v51 = vpop.eup %1298 }
 0x4ab   :  { %1018 = vmatmul.mubr.f32.vlgmr.msra.gmra.mrb[4].mxu1 %v1299_v51 }
 0x4ac   :  { %1260 = vmatpush3.bf16.msra.mxu1 %v1432_v5  ;;  %1087 = vmatprep.mubr.msk.f32.mxu1 %vm1384_vm0, %v1381_v0 }
 0x4ad   :  { %1261 = vmatprep.subr.bf16.mxu1 %v1383_v1 }
 0x4b0   :  { %1263 = vmatpush3.bf16.msra.mxu1 %v1435_v7 }
 0x4b1   :  { %1264 = vmatprep.subr.bf16.mxu1 %v1383_v1 }
 0x4b4   :  { %1266 = vmatpush3.bf16.msra.mxu1 %v1441_v10 }
 0x4b5   :  { %1267 = vmatprep.subr.bf16.mxu1 %v1383_v1 }
 0x4b8   :  { %1269 = vmatpush3.bf16.msra.mxu1 %v1447_v13 }
 0x4b9   :  { %1270 = vmatprep.subr.bf16.mxu1 %v1383_v1 }
 0x4bc   :  { %1272 = vmatpush3.bf16.msra.mxu1 %v1453_v16 }
 0x4bd   :  { %1273 = vmatprep.subr.bf16.mxu1 %v1383_v1 }
 0x4c0   :  { %1275 = vmatpush3.bf16.msra.mxu1 %v1459_v19 }
 0x4c1   :  { %1276 = vmatprep.subr.bf16.mxu1 %v1383_v1 }
 0x4c4   :  { %1278 = vmatpush3.bf16.msra.mxu1 %v1465_v22 }
 0x4c5   :  { %1279 = vmatprep.subr.bf16.mxu1 %v1383_v1 }
 0x4c8   :  { %1281 = vmatpush3.bf16.msra.mxu1 %v1471_v25 }
 0x57e   :  { %v497_v53 = vpop.f32.mrb[4].mxu1 }
 0x57f   :  { %v501_v54 = vadd.f32 %v497_v53, %v430_v52  ;;  %v1019_v55 = vpop.f32.mrb[5].mxu1 }
 0x581   :  { %1300 = vtanh.f32 %v501_v54 }
 0x58b   :  { %v1301_v56 = vpop.eup %1300 }
 0x58c   :  { %1053 = vmatmul.mubr.f32.vlgmr.msra.gmra.mrb[6].mxu0 %v1301_v56 }
 0x65f   :  { %v571_v58 = vpop.f32.mrb[6].mxu0 }
 0x660   :  { %v575_v59 = vadd.f32 %v571_v58, %v504_v57  ;;  %v1054_v60 = vpop.f32.mrb[7].mxu0 }
 0x662   :  { %1302 = vtanh.f32 %v575_v59 }
 0x66c   :  { %v1303_v61 = vpop.eup %1302 }
 0x66d   :  { %1088 = vmatmul.mubr.f32.vlgmr.msra.gmra.mrb[6].mxu1 %v1303_v61 }
 0x740   :  { %v645_v63 = vpop.f32.mrb[6].mxu1 }
 0x741   :  { %v649_v0 = vadd.f32 %v645_v63, %v578_v62  ;;  %v1089_v1 = vpop.f32.mrb[7].mxu1 }
 0x743   :  { %1304 = vtanh.f32 %v649_v0 }
 0x74d   :  { %v1305_v2 = vpop.eup %1304 }
 0x74e   :  { %651 = vst [vmem:[#allocation7] sm:$0xff] %v1305_v2 }
 0x74f   :  { %1361 = shalt.err (!%p1358_p6)
}
 0x750   :  { %s1362_s10 = scalar_lea.hbm %s1600_s2, 128 }
 0x751   :  { %p1363_p7 = scmp.ne.s32.totalorder %s1600_s2, %s1362_s10  ;;  %p1366_p8 = scmp.lt.u32.totalorder %s1362_s10, %s1600_s2 }
 0x753   :  { %p1368_p9 = pnand %p1366_p8, %p1363_p7 }
 0x755   :  { %1371 = shalt.err (!%p1368_p9)
}
 0x756   :  { %661 = dma.vmem_to_hbm [thread:$0]  %s659_s6, 128, %s1600_s2, [#allocation6]  }
 0x757   :  { %1376 = dma.done.wait [#allocation6], 128  }
 0x758   :  { %1377 = vsyncadd [#allocation6], 4294967168 }
 0x759   :  { %665 = vsyncpa [#allocation5], 1 }
 0x75a   :  { %666 = vsyncpa [#allocation6], 1 }
 0x75b   :  { %667 = vsyncmov [#allocation3] }
 0x75e   :  { %s668_s17 = vpop.sfrf %667 }
 0x75f   :  { %p673_p10 = scmp.ne.s32.totalorder %s668_s17, 0 }
 0x761   :  { %672 = shalt.err (%p673_p10)  }

</bundles_post_ra>
